<compile_context>
chip_gen: v7x
topology: tpu7x:2x2x1
jax: 0.10.0
libtpu: 0.0.40
codegen_flags: <defaults>
</compile_context>

<pallas_src>
import functools
import math

import jax
import jax.numpy as jnp
from jax.experimental import pallas as pl
from jax.experimental.pallas import tpu as pltpu


_VMEM_LIMIT_BYTES = 32 * 1024 * 1024   # explicit scoped-VMEM limit (safe on v5e/v6e/v7x)
_BLOCK_BYTES = 2 * 1024 * 1024         # target bytes per pipelined (double-buffered) block


# ---------------------------------------------------------------------------
# Fused kernels: raw image row-bands -> in-kernel patchify -> [LayerNorm] -> matmul
# ---------------------------------------------------------------------------

def _fused_ln_linear_kernel(x_ref, w_ref, g_ref, b_ref, bias_ref, o_ref, *,
                            gw: int, pw: int, eps: float):
    """patchnorm branch: regroup band -> LayerNorm over K (f32) -> bf16 matmul -> +bias."""
    rb, ph, _ = x_ref.shape
    K = ph * pw
    x = x_ref[...].astype(jnp.float32)              # (rb, ph, W)  f32 LN stats (torch-exact)
    x = x.reshape(rb, ph, gw, pw)                   # split lanes W -> (g, q)
    x = jnp.swapaxes(x, 1, 2)                       # (rb, gw, ph, pw)
    patches = x.reshape(rb * gw, K)                 # (Mblk, K): torch (p, q) flatten order
    mean = jnp.mean(patches, axis=-1, keepdims=True)
    cen = patches - mean
    var = jnp.mean(cen * cen, axis=-1, keepdims=True)     # biased var (torch LayerNorm)
    xn = cen * jax.lax.rsqrt(var + eps)
    xn = xn * g_ref[...] + b_ref[...]                     # gamma/beta resident, f32
    out = jnp.dot(xn.astype(jnp.bfloat16), w_ref[...],    # bf16 x bf16 -> f32 acc (MXU)
                  preferred_element_type=jnp.float32)
    out = out + bias_ref[...]                             # f32 bias
    o_ref[...] = out.astype(o_ref.dtype)


def _fused_linear_kernel(x_ref, w_ref, o_ref, *, gw: int, pw: int):
    """conv-as-matmul branch: regroup band -> bf16 matmul (Conv2d has bias=False)."""
    rb, ph, _ = x_ref.shape
    K = ph * pw
    x = x_ref[...].astype(jnp.float32)
    x = x.reshape(rb, ph, gw, pw)
    x = jnp.swapaxes(x, 1, 2)
    patches = x.reshape(rb * gw, K)
    out = jnp.dot(patches.astype(jnp.bfloat16), w_ref[...],
                  preferred_element_type=jnp.float32)
    o_ref[...] = out.astype(o_ref.dtype)


# ---------------------------------------------------------------------------
# Fallback kernels: pre-patchified (M, K) rows -> [LayerNorm] -> matmul
# (used only if Mosaic cannot lower the in-kernel regroup for a given config)
# ---------------------------------------------------------------------------

def _rows_ln_linear_kernel(x_ref, w_ref, g_ref, b_ref, bias_ref, o_ref, *, eps: float):
    x = x_ref[...].astype(jnp.float32)
    mean = jnp.mean(x, axis=-1, keepdims=True)
    cen = x - mean
    var = jnp.mean(cen * cen, axis=-1, keepdims=True)
    xn = cen * jax.lax.rsqrt(var + eps)
    xn = xn * g_ref[...] + b_ref[...]
    out = jnp.dot(xn.astype(jnp.bfloat16), w_ref[...],
                  preferred_element_type=jnp.float32) + bias_ref[...]
    o_ref[...] = out.astype(o_ref.dtype)


def _rows_linear_kernel(x_ref, w_ref, o_ref):
    out = jnp.dot(x_ref[...].astype(jnp.bfloat16), w_ref[...],
                  preferred_element_type=jnp.float32)
    o_ref[...] = out.astype(o_ref.dtype)


# ---------------------------------------------------------------------------
# pallas_call wrappers
# ---------------------------------------------------------------------------

def _pick_band_tile(nb, ph, w_pix, gw, n_out, in_bytes):
    """Rows-of-patches (bands) per grid step: VMEM-budgeted, >=2 grid steps when possible,
    and rb*gw a multiple of 8 so the 2-D output block is sublane-aligned."""
    in_band = ph * w_pix * in_bytes
    out_band = gw * n_out * 2                    # bf16 tokens
    rb = max(1, min(_BLOCK_BYTES // max(in_band, 1), _BLOCK_BYTES // max(out_band, 1)))
    if nb >= 2:
        rb = min(rb, pl.cdiv(nb, 2))             # >= 2 steps -> both v7x TensorCores busy
    unit = 8 // math.gcd(gw, 8)
    rb = max(unit, (rb // unit) * unit)
    if rb >= nb:
        rb = nb                                  # single full block (block == full dims is legal)
    return rb


def _tokenize_fused(x, w, gamma, beta, bias, *, grid_size, patch_size,
                    apply_ln, eps=1e-5, out_dtype=jnp.bfloat16):
    """x: (B, 1, H, W) float image.  Returns (B, gh*gw, N) tokens (out_dtype)."""
    B, _, H, W = x.shape
    gh, gw = grid_size
    ph, pw = patch_size
    K = ph * pw
    N = w.shape[1]
    nb = B * gh
    xr = x.reshape(nb, ph, W)                    # free metadata reshape (contiguous split)

    rb = _pick_band_tile(nb, ph, W, gw, N, x.dtype.itemsize)
    grid = (pl.cdiv(nb, rb),)

    x_spec = pl.BlockSpec((rb, ph, W), lambda i: (i, 0, 0))
    if K * N * 2 > (1 << 20):
        # Large resident weight and a grid-invariant index_map: single-buffer it so the
        # redundant second copy doesn't eat v7x's smaller (64 MiB) VMEM headroom.
        w_spec = pl.BlockSpec((K, N), lambda i: (0, 0), pipeline_mode=pl.Buffered(1))
    else:
        w_spec = pl.BlockSpec((K, N), lambda i: (0, 0))
    o_spec = pl.BlockSpec((rb * gw, N), lambda i: (i, 0))
    out_shape = jax.ShapeDtypeStruct((nb * gw, N), out_dtype)
    params = pltpu.CompilerParams(dimension_semantics=("parallel",),
                                  vmem_limit_bytes=_VMEM_LIMIT_BYTES)

    if apply_ln:
        kernel = functools.partial(_fused_ln_linear_kernel, gw=gw, pw=pw, eps=eps)
        in_specs = [x_spec, w_spec,
                    pl.BlockSpec((1, K), lambda i: (0, 0)),
                    pl.BlockSpec((1, K), lambda i: (0, 0)),
                    pl.BlockSpec((1, N), lambda i: (0, 0))]
        args = (xr, w, gamma, beta, bias)
    else:
        kernel = functools.partial(_fused_linear_kernel, gw=gw, pw=pw)
        in_specs = [x_spec, w_spec]
        args = (xr, w)

    out = pl.pallas_call(
        kernel, out_shape=out_shape, grid=grid,
        in_specs=in_specs, out_specs=o_spec,
        compiler_params=params,
    )(*args)
    return out.reshape(B, gh * gw, N)            # free reshape (contiguous merge)


def _tokenize_rows(patches, w, gamma, beta, bias, *, apply_ln, eps=1e-5,
                   out_dtype=jnp.bfloat16):
    """Fallback: patches (M, K) f32 -> tokens (M, N) out_dtype."""
    M, K = patches.shape
    N = w.shape[1]

    tm = max(8, min(_BLOCK_BYTES // max(K * patches.dtype.itemsize, 1),
                    _BLOCK_BYTES // max(N * 2, 1)))
    if M >= 2:
        tm = min(tm, pl.cdiv(M, 2))              # >= 2 grid steps when possible (v7x)
    tm = max(8, (tm // 8) * 8)
    if tm >= M:
        tm = M
    grid = (pl.cdiv(M, tm),)

    x_spec = pl.BlockSpec((tm, K), lambda i: (i, 0))
    w_spec = pl.BlockSpec((K, N), lambda i: (0, 0))
    o_spec = pl.BlockSpec((tm, N), lambda i: (i, 0))
    out_shape = jax.ShapeDtypeStruct((M, N), out_dtype)
    params = pltpu.CompilerParams(dimension_semantics=("parallel",),
                                  vmem_limit_bytes=_VMEM_LIMIT_BYTES)

    if apply_ln:
        kernel = functools.partial(_rows_ln_linear_kernel, eps=eps)
        in_specs = [x_spec, w_spec,
                    pl.BlockSpec((1, K), lambda i: (0, 0)),
                    pl.BlockSpec((1, K), lambda i: (0, 0)),
                    pl.BlockSpec((1, N), lambda i: (0, 0))]
        args = (patches, w, gamma, beta, bias)
    else:
        kernel = _rows_linear_kernel
        in_specs = [x_spec, w_spec]
        args = (patches, w)

    return pl.pallas_call(
        kernel, out_shape=out_shape, grid=grid,
        in_specs=in_specs, out_specs=o_spec,
        compiler_params=params,
    )(*args)


# ---------------------------------------------------------------------------
# Module port
# ---------------------------------------------------------------------------

class DepthTokenizerPallas:
    """JAX/Pallas port of DepthTokenizer.  Parameters built deterministically in __init__."""

    def __init__(self, grid_size, patch_size, width, input_patchnorm, key):
        self.grid_size = tuple(grid_size)
        self.patch_size = tuple(patch_size)
        self.width = width
        self.input_patchnorm = input_patchnorm
        self.num_patches = grid_size[0] * grid_size[1]
        self.eps = 1e-5
        patch_dim = patch_size[0] * patch_size[1] * 1      # in_channels == 1

        k_pos, k_w, k_b = jax.random.split(key, 3)
        scale = width ** (-0.5)
        self.pos_emb = scale * jax.random.normal(
            k_pos, (self.num_patches + 1, width), dtype=jnp.float32)

        bound = patch_dim ** (-0.5)
        if input_patchnorm:
            # LayerNorm(patch_dim): gamma=1, beta=0 (torch default init)
            self.ln_gamma = jnp.ones((1, patch_dim), jnp.float32)
            self.ln_beta = jnp.zeros((1, patch_dim), jnp.float32)
            # nn.Linear(patch_dim, width)
            w = jax.random.uniform(k_w, (width, patch_dim), jnp.float32, -bound, bound)
            b = jax.random.uniform(k_b, (width,), jnp.float32, -bound, bound)
            self.w = jnp.transpose(w).astype(jnp.bfloat16)   # (patch_dim, width) bf16 for MXU
            self.bias = b.reshape(1, width)                  # f32, added on f32 accumulator
        else:
            # nn.Conv2d(1, width, kernel=patch, stride=patch, bias=False)
            # == patchify -> matmul with the reshaped conv weight (same spatial order).
            w = jax.random.uniform(
                k_w, (width, 1, patch_size[0], patch_size[1]), jnp.float32, -bound, bound)
            self.w = jnp.transpose(w.reshape(width, patch_dim)).astype(jnp.bfloat16)
            self.bias = None
            self.ln_gamma = None
            self.ln_beta = None

        # Feature-detect the fused-patchify kernel once, eagerly, so the branch is a
        # static Python bool even if __call__ is later jit-ted.
        self._use_fused = self._probe_fused()

    def _probe_fused(self):
        H = self.grid_size[0] * self.patch_size[0]
        W = self.grid_size[1] * self.patch_size[1]
        try:
            probe = jnp.zeros((1, 1, H, W), jnp.float32)
            out = _tokenize_fused(probe, self.w, self.ln_gamma, self.ln_beta, self.bias,
                                  grid_size=self.grid_size, patch_size=self.patch_size,
                                  apply_ln=self.input_patchnorm, eps=self.eps)
            jax.block_until_ready(out)
            return True
        except Exception:
            # TODO(synk): the in-kernel patchify regroup (reshape/transpose of sub-(8,128)
            # tiles) is not lowerable by Mosaic for this config; fall back to XLA-side
            # patchify + the row-tiled kernel.
            return False

    def _patchify(self, x):
        # (B, 1, H, W) -> (B, P, K), matching torch reshape/permute(0,2,4,1,3,5)/reshape
        # (and Conv2d's spatial weight order).  Kept in f32 so LN stats match torch.
        B, C, H, W = x.shape
        gh, gw = self.grid_size
        ph, pw = self.patch_size
        x = x.reshape(B, C, gh, ph, gw, pw)
        x = jnp.transpose(x, (0, 2, 4, 1, 3, 5))
        return x.reshape(B, gh * gw, C * ph * pw)

    def __call__(self, x):
        B = x.shape[0]
        if self._use_fused:
            try:
                out = _tokenize_fused(x, self.w, self.ln_gamma, self.ln_beta, self.bias,
                                      grid_size=self.grid_size, patch_size=self.patch_size,
                                      apply_ln=self.input_patchnorm, eps=self.eps)
                return {'x': out, 'pos': self.pos_emb}
            except Exception:       # pragma: no cover — belt-and-braces for eager use
                self._use_fused = False
        patches = self._patchify(x.astype(jnp.float32))      # f32 intermediate (fallback only)
        flat = patches.reshape(B * self.num_patches, -1)
        out = _tokenize_rows(flat, self.w, self.ln_gamma, self.ln_beta, self.bias,
                             apply_ln=self.input_patchnorm, eps=self.eps)
        out = out.reshape(B, self.num_patches, self.width)
        return {'x': out, 'pos': self.pos_emb}               # Sample({'x':..., 'pos':...})


# ---------------------------------------------------------------------------
# Pure-JAX f32 reference (same bf16 weights, f32 math)
# ---------------------------------------------------------------------------

def _reference(tok: DepthTokenizerPallas, x):
    patches = tok._patchify(x.astype(jnp.float32))
    w = tok.w.astype(jnp.float32)
    if tok.input_patchnorm:
        mean = jnp.mean(patches, axis=-1, keepdims=True)
        var = jnp.mean((patches - mean) ** 2, axis=-1, keepdims=True)
        h = (patches - mean) / jnp.sqrt(var + tok.eps)
        h = h * tok.ln_gamma + tok.ln_beta
        return h @ w + tok.bias
    return patches @ w


if __name__ == "__main__":
    key = jax.random.PRNGKey(0)
    k_x, k_p1, k_p2 = jax.random.split(key, 3)

    # Small but TPU-friendly shapes: 16x64 image, 8x16 patches -> grid 2x4,
    # patch_dim K = 128, width N = 128 (lane-dense LN and stores), B = 2, C = 1.
    grid_size = (2, 4)
    patch_size = (8, 16)
    width = 128
    H = grid_size[0] * patch_size[0]
    W = grid_size[1] * patch_size[1]
    x = jax.random.normal(k_x, (2, 1, H, W), dtype=jnp.float32)

    ok = True
    for input_patchnorm, k_p in [(True, k_p1), (False, k_p2)]:
        tok = DepthTokenizerPallas(grid_size, patch_size, width, input_patchnorm, k_p)
        out = tok(x)
        jax.block_until_ready(out['x'])
        jax.block_until_ready(out['pos'])

        assert out['x'].shape == (2, tok.num_patches, width)
        assert out['x'].dtype == jnp.bfloat16
        assert out['pos'].shape == (tok.num_patches + 1, width)

        ref = _reference(tok, x)
        err = float(jnp.max(jnp.abs(out['x'].astype(jnp.float32) - ref)))
        scale = float(jnp.max(jnp.abs(ref))) + 1e-6
        ok = ok and (err / scale < 3e-2)          # bf16 operand/output rounding tolerance

    if ok:
        print("KERNEL_OK")
</pallas_src>

<mosaic_0001>
module attributes {stable_mosaic.version = 11 : i64} {
  func.func @_fused_ln_linear_kernel(%arg0: i32, %arg1: memref<2x8x64xf32, #tpu.memory_space<vmem>>, %arg2: memref<128x128xbf16, #tpu.memory_space<vmem>>, %arg3: memref<1x128xf32, #tpu.memory_space<vmem>>, %arg4: memref<1x128xf32, #tpu.memory_space<vmem>>, %arg5: memref<1x128xf32, #tpu.memory_space<vmem>>, %arg6: memref<8x128xbf16, #tpu.memory_space<vmem>>) attributes {dimension_semantics = [#tpu.dimension_semantics<parallel>], iteration_bounds = array<i64: 1>, scalar_prefetch = 0 : i64, scratch_operands = 0 : i64, tpu.core_type = #tpu.core_type<tc>, window_params = [{transform_indices = @transform_0, window_bounds = array<i64: 2, 8, 64>}, {pipeline_mode = #tpu.pipeline_mode<synchronous>, transform_indices = @transform_1, window_bounds = array<i64: 128, 128>}, {pipeline_mode = #tpu.pipeline_mode<synchronous>, transform_indices = @transform_2, window_bounds = array<i64: 1, 128>}, {pipeline_mode = #tpu.pipeline_mode<synchronous>, transform_indices = @transform_3, window_bounds = array<i64: 1, 128>}, {pipeline_mode = #tpu.pipeline_mode<synchronous>, transform_indices = @transform_4, window_bounds = array<i64: 1, 128>}, {transform_indices = @transform_5, window_bounds = array<i64: 8, 128>}]} {
    %c0 = arith.constant 0 : index
    %c0_0 = arith.constant 0 : index
    %c0_1 = arith.constant 0 : index
    %0 = vector.load %arg1[%c0, %c0_0, %c0_1] : memref<2x8x64xf32, #tpu.memory_space<vmem>>, vector<2x8x64xf32>
    %1 = vector.shape_cast %0 : vector<2x8x64xf32> to vector<2x8x4x16xf32>
    %2 = tpu.transpose %1, [0, 2, 1, 3] : vector<2x8x4x16xf32> -> vector<2x4x8x16xf32>
    %3 = vector.shape_cast %2 : vector<2x4x8x16xf32> to vector<8x128xf32>
    %cst = arith.constant dense<0.000000e+00> : vector<8xf32>
    %4 = vector.multi_reduction <add>, %3, %cst [1] : vector<8x128xf32> to vector<8xf32>
    %5 = vector.shape_cast %4 : vector<8xf32> to vector<8x1xf32>
    %cst_2 = arith.constant 1.280000e+02 : f32
    %6 = vector.broadcast %cst_2 : f32 to vector<8x1xf32>
    %7 = arith.divf %5, %6 : vector<8x1xf32>
    %8 = vector.broadcast %7 : vector<8x1xf32> to vector<8x128xf32>
    %9 = arith.subf %3, %8 : vector<8x128xf32>
    %10 = arith.mulf %9, %9 : vector<8x128xf32>
    %cst_3 = arith.constant dense<0.000000e+00> : vector<8xf32>
    %11 = vector.multi_reduction <add>, %10, %cst_3 [1] : vector<8x128xf32> to vector<8xf32>
    %12 = vector.shape_cast %11 : vector<8xf32> to vector<8x1xf32>
    %cst_4 = arith.constant 1.280000e+02 : f32
    %13 = vector.broadcast %cst_4 : f32 to vector<8x1xf32>
    %14 = arith.divf %12, %13 : vector<8x1xf32>
    %cst_5 = arith.constant 9.99999974E-6 : f32
    %15 = vector.broadcast %cst_5 : f32 to vector<8x1xf32>
    %16 = arith.addf %14, %15 : vector<8x1xf32>
    %17 = math.rsqrt %16 : vector<8x1xf32>
    %18 = vector.broadcast %17 : vector<8x1xf32> to vector<8x128xf32>
    %19 = arith.mulf %9, %18 : vector<8x128xf32>
    %c0_6 = arith.constant 0 : index
    %c0_7 = arith.constant 0 : index
    %20 = vector.load %arg3[%c0_6, %c0_7] : memref<1x128xf32, #tpu.memory_space<vmem>>, vector<1x128xf32>
    %21 = vector.broadcast %20 : vector<1x128xf32> to vector<8x128xf32>
    %22 = arith.mulf %19, %21 : vector<8x128xf32>
    %c0_8 = arith.constant 0 : index
    %c0_9 = arith.constant 0 : index
    %23 = vector.load %arg4[%c0_8, %c0_9] : memref<1x128xf32, #tpu.memory_space<vmem>>, vector<1x128xf32>
    %24 = vector.broadcast %23 : vector<1x128xf32> to vector<8x128xf32>
    %25 = arith.addf %22, %24 : vector<8x128xf32>
    %26 = arith.truncf %25 : vector<8x128xf32> to vector<8x128xbf16>
    %c0_10 = arith.constant 0 : index
    %c0_11 = arith.constant 0 : index
    %27 = vector.load %arg2[%c0_10, %c0_11] : memref<128x128xbf16, #tpu.memory_space<vmem>>, vector<128x128xbf16>
    %cst_12 = arith.constant dense<0.000000e+00> : vector<8x128xf32>
    %28 = tpu.matmul %26, %27, %cst_12 {dimension_numbers = #tpu.dot_dimension_numbers<[1], [0], [0], [1], [0, 0, 1, 1], [], []>} : vector<8x128xbf16>, vector<128x128xbf16>, vector<8x128xf32> -> vector<8x128xf32>
    %c0_13 = arith.constant 0 : index
    %c0_14 = arith.constant 0 : index
    %29 = vector.load %arg5[%c0_13, %c0_14] : memref<1x128xf32, #tpu.memory_space<vmem>>, vector<1x128xf32>
    %30 = vector.broadcast %29 : vector<1x128xf32> to vector<8x128xf32>
    %31 = arith.addf %28, %30 : vector<8x128xf32>
    %32 = arith.truncf %31 : vector<8x128xf32> to vector<8x128xbf16>
    %c0_15 = arith.constant 0 : index
    %c0_16 = arith.constant 0 : index
    %33 = vector.load %arg6[%c0_15, %c0_16] : memref<8x128xbf16, #tpu.memory_space<vmem>>, vector<8x128xbf16>
    tpu.vector_store %arg6[%c0_15, %c0_16], %32 {strides = array<i32>} : memref<8x128xbf16, #tpu.memory_space<vmem>>, vector<8x128xbf16>,
    return
  }
  func.func @transform_0(%arg0: i32) -> (i32, i32, i32) {
    %c0_i32 = arith.constant 0 : i32
    %c0_i32_0 = arith.constant 0 : i32
    %c0_i32_1 = arith.constant 0 : i32
    return %arg0, %c0_i32, %c0_i32_0 : i32, i32, i32
  }
  func.func @transform_1(%arg0: i32) -> (i32, i32) {
    %c0_i32 = arith.constant 0 : i32
    %c0_i32_0 = arith.constant 0 : i32
    %c0_i32_1 = arith.constant 0 : i32
    return %c0_i32, %c0_i32_0 : i32, i32
  }
  func.func @transform_2(%arg0: i32) -> (i32, i32) {
    %c0_i32 = arith.constant 0 : i32
    %c0_i32_0 = arith.constant 0 : i32
    %c0_i32_1 = arith.constant 0 : i32
    return %c0_i32, %c0_i32_0 : i32, i32
  }
  func.func @transform_3(%arg0: i32) -> (i32, i32) {
    %c0_i32 = arith.constant 0 : i32
    %c0_i32_0 = arith.constant 0 : i32
    %c0_i32_1 = arith.constant 0 : i32
    return %c0_i32, %c0_i32_0 : i32, i32
  }
  func.func @transform_4(%arg0: i32) -> (i32, i32) {
    %c0_i32 = arith.constant 0 : i32
    %c0_i32_0 = arith.constant 0 : i32
    %c0_i32_1 = arith.constant 0 : i32
    return %c0_i32, %c0_i32_0 : i32, i32
  }
  func.func @transform_5(%arg0: i32) -> (i32, i32) {
    %c0_i32 = arith.constant 0 : i32
    %c0_i32_0 = arith.constant 0 : i32
    return %arg0, %c0_i32 : i32, i32
  }
}

module attributes {stable_mosaic.version = 11 : i64} {
  func.func @_rows_ln_linear_kernel(%arg0: i32, %arg1: memref<8x128xf32, #tpu.memory_space<vmem>>, %arg2: memref<128x128xbf16, #tpu.memory_space<vmem>>, %arg3: memref<1x128xf32, #tpu.memory_space<vmem>>, %arg4: memref<1x128xf32, #tpu.memory_space<vmem>>, %arg5: memref<1x128xf32, #tpu.memory_space<vmem>>, %arg6: memref<8x128xbf16, #tpu.memory_space<vmem>>) attributes {dimension_semantics = [#tpu.dimension_semantics<parallel>], iteration_bounds = array<i64: 2>, scalar_prefetch = 0 : i64, scratch_operands = 0 : i64, tpu.core_type = #tpu.core_type<tc>, window_params = [{transform_indices = @transform_0, window_bounds = array<i64: 8, 128>}, {pipeline_mode = #tpu.pipeline_mode<synchronous>, transform_indices = @transform_1, window_bounds = array<i64: 128, 128>}, {pipeline_mode = #tpu.pipeline_mode<synchronous>, transform_indices = @transform_2, window_bounds = array<i64: 1, 128>}, {pipeline_mode = #tpu.pipeline_mode<synchronous>, transform_indices = @transform_3, window_bounds = array<i64: 1, 128>}, {pipeline_mode = #tpu.pipeline_mode<synchronous>, transform_indices = @transform_4, window_bounds = array<i64: 1, 128>}, {transform_indices = @transform_5, window_bounds = array<i64: 8, 128>}]} {
    %c0 = arith.constant 0 : index
    %c0_0 = arith.constant 0 : index
    %0 = vector.load %arg1[%c0, %c0_0] : memref<8x128xf32, #tpu.memory_space<vmem>>, vector<8x128xf32>
    %cst = arith.constant dense<0.000000e+00> : vector<8xf32>
    %1 = vector.multi_reduction <add>, %0, %cst [1] : vector<8x128xf32> to vector<8xf32>
    %2 = vector.shape_cast %1 : vector<8xf32> to vector<8x1xf32>
    %cst_1 = arith.constant 1.280000e+02 : f32
    %3 = vector.broadcast %cst_1 : f32 to vector<8x1xf32>
    %4 = arith.divf %2, %3 : vector<8x1xf32>
    %5 = vector.broadcast %4 : vector<8x1xf32> to vector<8x128xf32>
    %6 = arith.subf %0, %5 : vector<8x128xf32>
    %7 = arith.mulf %6, %6 : vector<8x128xf32>
    %cst_2 = arith.constant dense<0.000000e+00> : vector<8xf32>
    %8 = vector.multi_reduction <add>, %7, %cst_2 [1] : vector<8x128xf32> to vector<8xf32>
    %9 = vector.shape_cast %8 : vector<8xf32> to vector<8x1xf32>
    %cst_3 = arith.constant 1.280000e+02 : f32
    %10 = vector.broadcast %cst_3 : f32 to vector<8x1xf32>
    %11 = arith.divf %9, %10 : vector<8x1xf32>
    %cst_4 = arith.constant 9.99999974E-6 : f32
    %12 = vector.broadcast %cst_4 : f32 to vector<8x1xf32>
    %13 = arith.addf %11, %12 : vector<8x1xf32>
    %14 = math.rsqrt %13 : vector<8x1xf32>
    %15 = vector.broadcast %14 : vector<8x1xf32> to vector<8x128xf32>
    %16 = arith.mulf %6, %15 : vector<8x128xf32>
    %c0_5 = arith.constant 0 : index
    %c0_6 = arith.constant 0 : index
    %17 = vector.load %arg3[%c0_5, %c0_6] : memref<1x128xf32, #tpu.memory_space<vmem>>, vector<1x128xf32>
    %18 = vector.broadcast %17 : vector<1x128xf32> to vector<8x128xf32>
    %19 = arith.mulf %16, %18 : vector<8x128xf32>
    %c0_7 = arith.constant 0 : index
    %c0_8 = arith.constant 0 : index
    %20 = vector.load %arg4[%c0_7, %c0_8] : memref<1x128xf32, #tpu.memory_space<vmem>>, vector<1x128xf32>
    %21 = vector.broadcast %20 : vector<1x128xf32> to vector<8x128xf32>
    %22 = arith.addf %19, %21 : vector<8x128xf32>
    %23 = arith.truncf %22 : vector<8x128xf32> to vector<8x128xbf16>
    %c0_9 = arith.constant 0 : index
    %c0_10 = arith.constant 0 : index
    %24 = vector.load %arg2[%c0_9, %c0_10] : memref<128x128xbf16, #tpu.memory_space<vmem>>, vector<128x128xbf16>
    %cst_11 = arith.constant dense<0.000000e+00> : vector<8x128xf32>
    %25 = tpu.matmul %23, %24, %cst_11 {dimension_numbers = #tpu.dot_dimension_numbers<[1], [0], [0], [1], [0, 0, 1, 1], [], []>} : vector<8x128xbf16>, vector<128x128xbf16>, vector<8x128xf32> -> vector<8x128xf32>
    %c0_12 = arith.constant 0 : index
    %c0_13 = arith.constant 0 : index
    %26 = vector.load %arg5[%c0_12, %c0_13] : memref<1x128xf32, #tpu.memory_space<vmem>>, vector<1x128xf32>
    %27 = vector.broadcast %26 : vector<1x128xf32> to vector<8x128xf32>
    %28 = arith.addf %25, %27 : vector<8x128xf32>
    %29 = arith.truncf %28 : vector<8x128xf32> to vector<8x128xbf16>
    %c0_14 = arith.constant 0 : index
    %c0_15 = arith.constant 0 : index
    %30 = vector.load %arg6[%c0_14, %c0_15] : memref<8x128xbf16, #tpu.memory_space<vmem>>, vector<8x128xbf16>
    tpu.vector_store %arg6[%c0_14, %c0_15], %29 {strides = array<i32>} : memref<8x128xbf16, #tpu.memory_space<vmem>>, vector<8x128xbf16>,
    return
  }
  func.func @transform_0(%arg0: i32) -> (i32, i32) {
    %c0_i32 = arith.constant 0 : i32
    %c0_i32_0 = arith.constant 0 : i32
    return %arg0, %c0_i32 : i32, i32
  }
  func.func @transform_1(%arg0: i32) -> (i32, i32) {
    %c0_i32 = arith.constant 0 : i32
    %c0_i32_0 = arith.constant 0 : i32
    %c0_i32_1 = arith.constant 0 : i32
    return %c0_i32, %c0_i32_0 : i32, i32
  }
  func.func @transform_2(%arg0: i32) -> (i32, i32) {
    %c0_i32 = arith.constant 0 : i32
    %c0_i32_0 = arith.constant 0 : i32
    %c0_i32_1 = arith.constant 0 : i32
    return %c0_i32, %c0_i32_0 : i32, i32
  }
  func.func @transform_3(%arg0: i32) -> (i32, i32) {
    %c0_i32 = arith.constant 0 : i32
    %c0_i32_0 = arith.constant 0 : i32
    %c0_i32_1 = arith.constant 0 : i32
    return %c0_i32, %c0_i32_0 : i32, i32
  }
  func.func @transform_4(%arg0: i32) -> (i32, i32) {
    %c0_i32 = arith.constant 0 : i32
    %c0_i32_0 = arith.constant 0 : i32
    %c0_i32_1 = arith.constant 0 : i32
    return %c0_i32, %c0_i32_0 : i32, i32
  }
  func.func @transform_5(%arg0: i32) -> (i32, i32) {
    %c0_i32 = arith.constant 0 : i32
    %c0_i32_0 = arith.constant 0 : i32
    return %arg0, %c0_i32 : i32, i32
  }
}

</mosaic_0001>

<bundles_post_ra>
// kernel: tpu_custom_call.1
= control target key start
LH: loop header
LB: loop body
LE: loop exit
PB: predicated region body
PF: predicated region fallthrough
CT: control target
= control target key end

     0   :  { %10 = vsyncpa [#allocation3], 0  ;;  %s987_s0 = inlined_call_operand.hbm [shape: f32[2,8,64], index: 0, kind: input, shape index: {}]   ;;  %s988_s1 = inlined_call_operand.hbm [shape: bf16[128,128], index: 1, kind: input, shape index: {}]   ;;  %s989_s2 = inlined_call_operand.vmem [shape: f32[1,128], index: 2, kind: input, shape index: {}]   ;;  %s990_s3 = inlined_call_operand.vmem [shape: f32[1,128], index: 3, kind: input, shape index: {}]   ;;  %s991_s4 = inlined_call_operand.vmem [shape: f32[1,128], index: 4, kind: input, shape index: {}]   ;;  %s992_s5 = inlined_call_operand.hbm [shape: bf16[8,128], index: 5, kind: output, shape index: {}]  }
   0x1   :  { %11 = vsyncpa [#allocation6], 0 }
   0x2   :  { %12 = vsyncpa [#allocation4], 0  ;;  %s831_s18 = smov [#allocation2]   ;;  %s759_s22 = scalar_lea.hbm %s987_s0, 256 }
   0x3   :  { %s18_s19 = sshll.u32 %s831_s18, 4  ;;  %p760_p0 = scmp.ne.s32.totalorder %s987_s0, %s759_s22  ;;  %s19_s19 = int_to_ptr.vmem [resolvable:$true] %s18_s19 }
   0x4   :  { %p763_p1 = scmp.lt.u32.totalorder %s759_s22, %s987_s0 }
   0x6   :  { %p765_p2 = pnand %p763_p1, %p760_p0 }
   0x8   :  { %768 = shalt.err (!%p765_p2)
}
   0x9   :  { %s769_s27 = scalar_lea.vmem %s19_s19, 256  ;;  %p774_p4 = scmp.lt.s32.totalorder %s19_s19, %s19_s19 }
   0xa   :  { %p770_p3 = scmp.ne.s32.totalorder %s19_s19, %s769_s27  ;;  %p775_p5 = scmp.lt.s32.totalorder %s769_s27, %s769_s27 }
   0xc   :  { %p776_p6 = por %p775_p5, %p774_p4 }
   0xe   :  { %p777_p7 = pnand %p776_p6, %p770_p3 }
  0x10   :  { %780 = shalt.err (!%p777_p7)
}
  0x11   :  { %s832_s28 = smov 128   ;;  %s833_s29 = smov 8  }
  0x12   :  { %24 = dma.hbm_to_vmem [thread:$0]  %s987_s0, 256, %s19_s19, [#allocation3], %s832_s28, %s832_s28, %s833_s29  }
  0x13   :  { %s834_s7 = smov [#allocation5]   ;;  %s781_s11 = scalar_lea.hbm %s988_s1, 1024 }
  0x14   :  { %s30_s8 = sshll.u32 %s834_s7, 4  ;;  %p782_p8 = scmp.ne.s32.totalorder %s988_s1, %s781_s11  ;;  %s31_s8 = int_to_ptr.vmem [resolvable:$true] %s30_s8 }
  0x15   :  { %p785_p9 = scmp.lt.u32.totalorder %s781_s11, %s988_s1 }
  0x17   :  { %p787_p10 = pnand %p785_p9, %p782_p8 }
  0x19   :  { %790 = shalt.err (!%p787_p10)
}
  0x1a   :  { %s791_s16 = scalar_lea.vmem %s31_s8, 1024  ;;  %p796_p12 = scmp.lt.s32.totalorder %s31_s8, %s31_s8 }
  0x1b   :  { %p792_p11 = scmp.ne.s32.totalorder %s31_s8, %s791_s16  ;;  %p797_p13 = scmp.lt.s32.totalorder %s791_s16, %s791_s16 }
  0x1d   :  { %p798_p0 = por %p797_p13, %p796_p12 }
  0x1f   :  { %p799_p1 = pnand %p798_p0, %p792_p11 }
  0x21   :  { %802 = shalt.err (!%p799_p1)
}
  0x22   :  { %s835_s0 = smov 64   ;;  %s836_s17 = smov 4  }
  0x23   :  { %36 = dma.hbm_to_vmem [thread:$0]  %s988_s1, 1024, %s31_s8, [#allocation6], %s835_s0, %s835_s0, %s836_s17  }
  0x24   :  { %825 = dma.done.wait [#allocation3], 256  }
  0x25   :  { %826 = vsyncadd [#allocation3], 4294967040 }
  0x26   :  { %827 = dma.done.wait [#allocation6], 1024  }
  0x27   :  { %828 = vsyncadd [#allocation6], 4294966272  ;;  %v50_v0 = vld [vmem:[#allocation2] sm:$0xff]  ;;  %v51_v1 = vld [vmem:[#allocation2 + $0x8] sm:$0xff]  ;;  %s837_s20 = smov 96   ;;  %s838_s21 = smov 112   ;;  %v77_v4 = vlaneseq }
  0x28   :  { %60 = vrot.lane.b32.xlu1 %v50_v0, %s837_s20  ;;  %54 = vrot.lane.b32.xlu0 %v50_v0, %s838_s21  ;;  %s839_s22 = smov 80   ;;  %v840_v2 = vmov 1983009808   ;;  %v841_v7 = vmov 1934713408   ;;  %s842_s1 = smov 32  }
  0x29   :  { %v75_v3 = vunpack.c.l.s4 %v840_v2  ;;  %v107_v8 = vunpack.c.l.s4 %v841_v7  ;;  %v78_v10 = vshrl.u32 %v77_v4, 7  ;;  %s843_s23 = smov 16   ;;  %s844_s24 = smov 48   ;;  %vm508_vm0 = vcmask 130048  }
  0x2a   :  { %vm510_vm1 = vcmask 261120   ;;  %vm512_vm2 = vcmask 392192   ;;  %vm514_vm3 = vcmask 523264   ;;  %vm516_vm4 = vcmask 654336   ;;  %s847_s6 = smov [#allocation7]  }
  0x2b   :  { %v76_v9 = vunpack.c.0.s8 %v75_v3  ;;  %v108_v15 = vunpack.c.0.s8 %v107_v8  ;;  %vm518_vm5 = vcmask 785408   ;;  %vm520_vm6 = vcmask 916480   ;;  %s670_s7 = sshll.u32 %s847_s6, 4  ;;  %s671_s7 = int_to_ptr.vmem [resolvable:$true] %s670_s7 }
  0x2c   :  { %62 = vrot.lane.b32.xlu1 %v51_v1, %s837_s20  ;;  %56 = vrot.lane.b32.xlu0 %v51_v1, %s838_s21  ;;  %vm846_vm7 = vmmov 0   ;;  %p808_p3 = scmp.lt.s32.totalorder %s671_s7, %s671_s7 }
  0x2d   :  { %v910_v16 = vsub.s32 %v76_v9, %v78_v10  ;;  %v914_v27 = vsub.s32 %v108_v15, %v78_v10 }
  0x30   :  { %68 = vrot.lane.b32.xlu1 %v51_v1, %s839_s22  ;;  %66 = vrot.lane.b32.xlu0 %v50_v0, %s839_s22 }
  0x9a   :  { %v61_v5 = vpop.permute.xlu1 %60  ;;  %v55_v6 = vpop.permute.xlu0 %54 }
  0x9b   :  { %v72_v17 = vcombine.low %v50_v0, %v61_v5  ;;  %v73_v18 = vcombine.high %v50_v0, %v61_v5 }
  0x9d   :  { %v80_v32 = vrot.slane %v72_v17, %v910_v16  ;;  %v87_v33 = vrot.slane %v73_v18, %v910_v16 }
  0x9e   :  { %v63_v11 = vpop.permute.xlu1 %62  ;;  %v57_v12 = vpop.permute.xlu0 %56 }
  0x9f   :  { %v140_v13 = vcombine.low %v51_v1, %v63_v11  ;;  %v141_v14 = vcombine.high %v51_v1, %v63_v11 }
  0xa1   :  { %v148_v25 = vrot.slane %v140_v13, %v910_v16  ;;  %v155_v26 = vrot.slane %v141_v14, %v910_v16 }
  0xa2   :  { %v69_v19 = vpop.permute.xlu1 %68  ;;  %v67_v20 = vpop.permute.xlu0 %66 }
  0xa3   :  { %v156_v21 = vcombine.low %v57_v12, %v69_v19  ;;  %v157_v22 = vcombine.high %v57_v12, %v69_v19  ;;  %v88_v23 = vcombine.low %v55_v6, %v67_v20  ;;  %v89_v24 = vcombine.high %v55_v6, %v67_v20 }
  0xa5   :  { %v164_v28 = vrot.slane %v156_v21, %v910_v16  ;;  %v171_v29 = vrot.slane %v157_v22, %v910_v16  ;;  %v96_v30 = vrot.slane %v88_v23, %v910_v16  ;;  %v103_v31 = vrot.slane %v89_v24, %v910_v16 }
  0xa7   :  { %v172_v34 = vcombine.low %v148_v25, %v164_v28  ;;  %v173_v35 = vcombine.high %v148_v25, %v164_v28  ;;  %v188_v36 = vcombine.low %v155_v26, %v171_v29  ;;  %v189_v37 = vcombine.high %v155_v26, %v171_v29 }
  0xa8   :  { %v104_v38 = vcombine.low %v80_v32, %v96_v30  ;;  %v105_v39 = vcombine.high %v80_v32, %v96_v30  ;;  %v120_v40 = vcombine.low %v87_v33, %v103_v31  ;;  %v121_v41 = vcombine.high %v87_v33, %v103_v31 }
  0xa9   :  { %v180_v42 = vrot.slane %v172_v34, %v914_v27  ;;  %v187_v43 = vrot.slane %v173_v35, %v914_v27  ;;  %v196_v44 = vrot.slane %v188_v36, %v914_v27  ;;  %v203_v45 = vrot.slane %v189_v37, %v914_v27 }
  0xaa   :  { %v112_v46 = vrot.slane %v104_v38, %v914_v27  ;;  %v119_v47 = vrot.slane %v105_v39, %v914_v27  ;;  %v128_v48 = vrot.slane %v120_v40, %v914_v27  ;;  %v135_v49 = vrot.slane %v121_v41, %v914_v27 }
  0xab   :  { %v276_v50 = vcombine.low %v180_v42, %v187_v43  ;;  %v682_v51 = vcombine.high %v180_v42, %v187_v43  ;;  %v292_v52 = vcombine.low %v196_v44, %v203_v45  ;;  %v683_v53 = vcombine.high %v196_v44, %v203_v45 }
  0xac   :  { %v208_v54 = vcombine.low %v112_v46, %v119_v47  ;;  %v680_v55 = vcombine.high %v112_v46, %v119_v47  ;;  %v224_v56 = vcombine.low %v128_v48, %v135_v49  ;;  %v681_v57 = vcombine.high %v128_v48, %v135_v49 }
  0xad   :  { %v283_v58 = vrot.slane %v276_v50, %v910_v16  ;;  %v291_v59 = vrot.slane %v682_v51, %v910_v16  ;;  %v299_v60 = vrot.slane %v292_v52, %v910_v16  ;;  %v307_v61 = vrot.slane %v683_v53, %v910_v16 }
  0xae   :  { %v215_v62 = vrot.slane %v208_v54, %v910_v16  ;;  %v223_v63 = vrot.slane %v680_v55, %v910_v16  ;;  %v231_v0 = vrot.slane %v224_v56, %v910_v16  ;;  %v239_v1 = vrot.slane %v681_v57, %v910_v16 }
  0xaf   :  { %v308_v2 = vcombine.low %v283_v58, %v291_v59  ;;  %v309_v3 = vcombine.high %v283_v58, %v291_v59  ;;  %v324_v4 = vcombine.low %v299_v60, %v307_v61  ;;  %v325_v5 = vcombine.high %v299_v60, %v307_v61 }
  0xb0   :  { %v240_v6 = vcombine.low %v215_v62, %v223_v63  ;;  %v241_v7 = vcombine.high %v215_v62, %v223_v63  ;;  %v256_v8 = vcombine.low %v231_v0, %v239_v1  ;;  %v257_v9 = vcombine.high %v231_v0, %v239_v1 }
  0xb1   :  { %v316_v10 = vrot.slane %v308_v2, %v914_v27  ;;  %v323_v11 = vrot.slane %v309_v3, %v914_v27  ;;  %v332_v12 = vrot.slane %v324_v4, %v914_v27  ;;  %v339_v13 = vrot.slane %v325_v5, %v914_v27 }
  0xb2   :  { %v248_v14 = vrot.slane %v240_v6, %v914_v27  ;;  %v255_v15 = vrot.slane %v241_v7, %v914_v27  ;;  %v264_v17 = vrot.slane %v256_v8, %v914_v27  ;;  %v271_v18 = vrot.slane %v257_v9, %v914_v27  ;;  %v749_v8 = vld [vmem:[#allocation5] sm:$0xff]  }
  0xb3   :  { %v688_v19 = vcombine.low %v316_v10, %v323_v11  ;;  %v690_v20 = vcombine.high %v316_v10, %v323_v11  ;;  %v689_v21 = vcombine.low %v332_v12, %v339_v13  ;;  %v691_v22 = vcombine.high %v332_v12, %v339_v13  ;;  %v750_v10 = vld [vmem:[#allocation5 + $0x8] sm:$0xff]  }
  0xb4   :  { %v684_v23 = vcombine.low %v248_v14, %v255_v15  ;;  %v686_v24 = vcombine.high %v248_v14, %v255_v15  ;;  %v685_v25 = vcombine.low %v264_v17, %v271_v18  ;;  %v687_v26 = vcombine.high %v264_v17, %v271_v18  ;;  %v751_v15 = vld [vmem:[#allocation5 + $0x10] sm:$0xff]   ;;  %v752_v17 = vld [vmem:[#allocation5 + $0x18] sm:$0xff]   ;;  %v753_v18 = vld [vmem:[#allocation5 + $0x20] sm:$0xff]  }
  0xb5   :  { %v384_v28 = vrot.slane %v688_v19, %v910_v16  ;;  %v400_v29 = vrot.slane %v690_v20, %v910_v16  ;;  %v391_v30 = vrot.slane %v689_v21, %v910_v16  ;;  %v407_v31 = vrot.slane %v691_v22, %v910_v16  ;;  %v754_v19 = vld [vmem:[#allocation5 + $0x28] sm:$0xff]   ;;  %v755_v20 = vld [vmem:[#allocation5 + $0x30] sm:$0xff]   ;;  %v756_v21 = vld [vmem:[#allocation5 + $0x38] sm:$0xff]  }
  0xb6   :  { %v352_v32 = vrot.slane %v684_v23, %v910_v16  ;;  %v368_v33 = vrot.slane %v686_v24, %v910_v16  ;;  %v359_v34 = vrot.slane %v685_v25, %v910_v16  ;;  %v375_v35 = vrot.slane %v687_v26, %v910_v16  ;;  %v692_v26 = vld [vmem:[%s989_s2] ss:$0 sm:$0xff]  ;;  %s803_s2 = scalar_lea.vmem %s671_s7, 64 }
  0xb7   :  { %v441_v36 = vcombine.high %v384_v28, %v400_v29  ;;  %v440_v37 = vcombine.low %v384_v28, %v400_v29  ;;  %v456_v41 = vcombine.low %v391_v30, %v407_v31  ;;  %v457_v47 = vcombine.high %v391_v30, %v407_v31  ;;  %v693_v29 = vld [vmem:[%s990_s3] ss:$0 sm:$0xff]  ;;  %p804_p2 = scmp.ne.s32.totalorder %s671_s7, %s803_s2  ;;  %p809_p4 = scmp.lt.s32.totalorder %s803_s2, %s803_s2 }
  0xb8   :  { %v409_v38 = vcombine.high %v352_v32, %v368_v33  ;;  %v408_v39 = vcombine.low %v352_v32, %v368_v33  ;;  %v424_v40 = vcombine.low %v359_v34, %v375_v35  ;;  %v425_v46 = vcombine.high %v359_v34, %v375_v35  ;;  %v694_v33 = vld [vmem:[%s991_s4] ss:$0 sm:$0xff] }
  0xb9   :  { %v455_v42 = vrot.slane %v441_v36, %v914_v27  ;;  %v448_v43 = vrot.slane %v440_v37, %v914_v27  ;;  %v464_v50 = vrot.slane %v456_v41, %v914_v27  ;;  %v471_v55 = vrot.slane %v457_v47, %v914_v27  ;;  %p810_p5 = por %p809_p4, %p808_p3 }
  0xba   :  { %v423_v44 = vrot.slane %v409_v38, %v914_v27  ;;  %v416_v45 = vrot.slane %v408_v39, %v914_v27  ;;  %v432_v16 = vrot.slane %v424_v40, %v914_v27  ;;  %v439_v54 = vrot.slane %v425_v46, %v914_v27 }
  0xbb   :  { %v845_v9 = vmov 0.0   ;;  %p811_p6 = pnand %p810_p5, %p804_p2 }
  0xbc   :  { %v474_v48 = vcombine.low %v423_v44, %v455_v42  ;;  %v473_v49 = vcombine.high %v416_v45, %v448_v43  ;;  %v472_v51 = vcombine.low %v416_v45, %v448_v43  ;;  %v476_v52 = vcombine.low %v432_v16, %v464_v50  ;;  %712 = vmatprep.subr.bf16.mxu0 %v845_v9 }
  0xbd   :  { %v475_v53 = vcombine.high %v423_v44, %v455_v42  ;;  %v478_v56 = vcombine.low %v439_v54, %v471_v55  ;;  %v477_v57 = vcombine.high %v432_v16, %v464_v50  ;;  %v479_v58 = vcombine.high %v439_v54, %v471_v55  ;;  %713 = vmatpush3.bf16.msra.mxu0 %v749_v8 }
  0xbe   :  { %485 = vrot.lane.b32.xlu1 %v474_v48, %s842_s1  ;;  %481 = vrot.lane.b32.xlu0 %v473_v49, %s843_s23 }
  0xbf   :  { %714 = vmatprep.subr.bf16.mxu0 %v845_v9  ;;  %728 = vmatprep.mubr.msk.bf16.mxu0 %vm846_vm7, %v845_v9 }
  0xc1   :  { %715 = vmatpush3.bf16.msra.mxu0 %v750_v10 }
  0xc2   :  { %493 = vrot.lane.b32.xlu1 %v476_v52, %s835_s0  ;;  %489 = vrot.lane.b32.xlu0 %v475_v53, %s844_s24 }
  0xc3   :  { %716 = vmatprep.subr.bf16.mxu0 %v845_v9 }
  0xc5   :  { %717 = vmatpush3.bf16.msra.mxu0 %v751_v15 }
  0xc6   :  { %501 = vrot.lane.b32.xlu1 %v478_v56, %s837_s20  ;;  %497 = vrot.lane.b32.xlu0 %v477_v57, %s839_s22 }
  0xc7   :  { %718 = vmatprep.subr.bf16.mxu0 %v845_v9 }
  0xc9   :  { %719 = vmatpush3.bf16.msra.mxu0 %v752_v17 }
  0xca   :  { %505 = vrot.lane.b32.xlu0 %v479_v58, %s838_s21  ;;  %720 = vmatprep.subr.bf16.mxu0 %v845_v9 }
  0xcd   :  { %721 = vmatpush3.bf16.msra.mxu0 %v753_v18 }
  0xce   :  { %722 = vmatprep.subr.bf16.mxu0 %v845_v9 }
  0xd1   :  { %723 = vmatpush3.bf16.msra.mxu0 %v754_v19 }
  0xd2   :  { %724 = vmatprep.subr.bf16.mxu0 %v845_v9 }
  0xd5   :  { %725 = vmatpush3.bf16.msra.mxu0 %v755_v20 }
  0xd6   :  { %726 = vmatprep.subr.bf16.mxu0 %v845_v9 }
  0xd9   :  { %727 = vmatpush3.bf16.msra.mxu0 %v756_v21 }
 0x130   :  { %v486_v59 = vpop.permute.xlu1 %485  ;;  %v482_v60 = vpop.permute.xlu0 %481 }
 0x131   :  { %v509_v61 = vsel %vm508_vm0, %v472_v51, %v482_v60 }
 0x132   :  { %v511_v63 = vsel %vm510_vm1, %v509_v61, %v486_v59 }
 0x134   :  { %v494_v27 = vpop.permute.xlu1 %493  ;;  %v490_v62 = vpop.permute.xlu0 %489 }
 0x135   :  { %v513_v0 = vsel %vm512_vm2, %v511_v63, %v490_v62 }
 0x136   :  { %v515_v2 = vsel %vm514_vm3, %v513_v0, %v494_v27 }
 0x138   :  { %v498_v1 = vpop.permute.xlu0 %497  ;;  %v502_v3 = vpop.permute.xlu1 %501 }
 0x139   :  { %v517_v4 = vsel %vm516_vm4, %v515_v2, %v498_v1 }
 0x13a   :  { %v519_v6 = vsel %vm518_vm5, %v517_v4, %v502_v3 }
 0x13c   :  { %v506_v5 = vpop.permute.xlu0 %505 }
 0x13d   :  { %v521_v7 = vsel %vm520_vm6, %v519_v6, %v506_v5 }
 0x13e   :  { %522 = vadd.xlane.f32.xlu1 %v521_v7 }
 0x1cb   :  { %v523_v11 = vpop.xlane.xlu1 %522 }
 0x1cc   :  { %v525_v12 = vmul.f32 0.0078125, %v523_v11 }
 0x1ce   :  { %v526_v13 = vsub.f32 %v521_v7, %v525_v12 }
 0x1d0   :  { %v527_v14 = vmul.f32 %v526_v13, %v526_v13 }
 0x1d2   :  { %528 = vadd.xlane.f32.xlu0 %v527_v14 }
 0x25f   :  { %v529_v22 = vpop.xlane.xlu0 %528 }
 0x260   :  { %v530_v23 = vmul.f32 0.0078125, %v529_v22 }
 0x262   :  { %v531_v24 = vadd.f32 1e-05, %v530_v23 }
 0x264   :  { %757 = vrsqrt.f32 %v531_v24 }
 0x26e   :  { %v758_v25 = vpop.eup %757 }
 0x26f   :  { %v533_v28 = vmul.f32 %v758_v25, %v526_v13 }
 0x271   :  { %v541_v30 = vmul.f32 %v692_v26, %v533_v28 }
 0x273   :  { %v549_v31 = vadd.f32 %v693_v29, %v541_v30 }
 0x275   :  { %v550_v32 = vpack.c.bf16 %v549_v31, %v549_v31 }
 0x277   :  { %729 = vmatmul.mubr.bf16.vlgmr.msra.gmra.mrb[0].mxu0 %v550_v32 }
 0x34a   :  { %v656_v34 = vpop.f32.mrb[0].mxu0 }
 0x34b   :  { %v657_v35 = vadd.f32 %v694_v33, %v656_v34  ;;  %v730_v36 = vpop.f32.mrb[1].mxu0 }
 0x34c   :  { %v659_v37 = vpop.f32.mrb[2].mxu0 }
 0x34d   :  { %v662_v38 = vpack.c.bf16 %v657_v35, %v657_v35  ;;  %v731_v39 = vpop.f32.mrb[3].mxu0 }
 0x34f   :  { %663 = vst [vmem:[#allocation7] sm:$0xf] %v662_v38 }
 0x350   :  { %814 = shalt.err (!%p811_p6)
}
 0x351   :  { %s815_s4 = scalar_lea.hbm %s992_s5, 64 }
 0x352   :  { %p816_p7 = scmp.ne.s32.totalorder %s992_s5, %s815_s4  ;;  %p819_p8 = scmp.lt.u32.totalorder %s815_s4, %s992_s5 }
 0x354   :  { %p821_p9 = pnand %p819_p8, %p816_p7 }
 0x356   :  { %824 = shalt.err (!%p821_p9)
}
 0x357   :  { %673 = dma.vmem_to_hbm [thread:$0]  %s671_s7, 64, %s992_s5, [#allocation4]  }
 0x358   :  { %829 = dma.done.wait [#allocation4], 64  }
 0x359   :  { %830 = vsyncadd [#allocation4], 4294967232 }
 0x35a   :  { %677 = vsyncpa [#allocation3], 1 }
 0x35b   :  { %678 = vsyncpa [#allocation6], 1 }
 0x35c   :  { %679 = vsyncpa [#allocation4], 1 }

// kernel: tpu_custom_call.1
= control target key start
LH: loop header
LB: loop body
LE: loop exit
PB: predicated region body
PF: predicated region fallthrough
CT: control target
= control target key end

     0   :  { %10 = vsyncpa [#allocation3], 0  ;;  %s991_s0 = inlined_call_operand.hbm [shape: f32[16,128], index: 0, kind: input, shape index: {}]   ;;  %s992_s1 = inlined_call_operand.hbm [shape: bf16[128,128], index: 1, kind: input, shape index: {}]   ;;  %s993_s2 = inlined_call_operand.vmem [shape: f32[1,128], index: 2, kind: input, shape index: {}]   ;;  %s994_s3 = inlined_call_operand.vmem [shape: f32[1,128], index: 3, kind: input, shape index: {}]   ;;  %s995_s4 = inlined_call_operand.vmem [shape: f32[1,128], index: 4, kind: input, shape index: {}]   ;;  %s996_s5 = inlined_call_operand.hbm [shape: bf16[16,128], index: 5, kind: output, shape index: {}]  }
   0x1   :  { %12 = vsyncpa [#allocation3 + $0x1], 0 }
   0x2   :  { %13 = vsyncpa [#allocation6], 0 }
   0x3   :  { %14 = vsyncpa [#allocation4], 0 }
   0x4   :  { %16 = vsyncpa [#allocation4 + $0x1], 0  ;;  %s785_s18 = smov 0   ;;  %s787_s19 = smov 0  }
   0x5   :  { %s789_s20 = smov 0   ;;  %s791_s21 = smov 0  }
   0x6 LB: > { %s806_s22 = sadd.s32 4294967295, %s746_s21   ;;  %s493_s23 = sadd.s32 4294967294, %s746_s21   ;;  %s746_s21 = sphi %s791_s21, %s1016_s21   ;;  %s742_s20 = sphi %s789_s20, %s1015_s20   ;;  %s738_s19 = sphi %s787_s19, %s1014_s19   ;;  %s734_s18 = sphi %s785_s18, %s1013_s18  }
   0x7   : > { %p42_p0 = scmp.ne.s32.totalorder %s738_s19, %s734_s18  ;;  %p997_p1 = scmp.eq.s32.totalorder %s806_s22, 0 }
   0x8   : > { %p156_p3 = scmp.eq.s32.totalorder %s493_s23, 1  ;;  %p494_p5 = scmp.ge.s32.totalorder %s746_s21, 1 }
   0x9   : > { %p815_p4 = por %p997_p1, %p42_p0  ;;  %p163_p7 = scmp.lt.s32.totalorder %s746_s21, 3 }
   0xa   : > { %p820_p6 = por %p156_p3, %p42_p0  ;;  %s748_s27 = smov [#allocation5]  }
   0xb   : > { %s1000_s24 = scalar_select %p815_p4, 1, 0 }
   0xc   : > { %s1001_s25 = scalar_select %p820_p6, 1, 0 }
   0xd   : > { %p825_p8 = pnand %p494_p5, %p163_p7  ;;  %s175_s28 = sshll.u32 %s748_s27, 4  ;;  %s829_s28 = int_to_ptr.vmem [resolvable:$true] %s175_s28 }
   0xe   : > { %s841_s30 = sadd.s32 1, %s746_s21   ;;  %s29_s6 = sadd.s32 1, %s742_s20 }
   0xf   : > { %s1002_s26 = scalar_select %p825_p8, 1, 0 }
  0x10   : > { %p555_p9 = pneg %p825_p8  ;;  %s26_s7 = ssub.s32 %s746_s21, %s841_s30 }
  0x11   : > { %s618_s10 = scalar_lea.hbm %s992_s1, 1024 }
  0x12   : > { %p836_p11 = pnand %p555_p9, %p997_p1  ;;  %p619_p12 = scmp.ne.s32.totalorder %s992_s1, %s618_s10 }
  0x13   : > { %p625_p5 = scmp.lt.u32.totalorder %s618_s10, %s992_s1 }
  0x14   : > { %p620_p13 = pneg %p836_p11 }
  0x16   : > { %p621_p0 = pnand %p620_p13, %p619_p12 }
  0x18   : > { %p622_p3 = pneg %p621_p0 }
  0x1a   : > { %p627_p7 = pnand %p625_p5, %p622_p3 }
  0x1c   : > { %630 = shalt.err (!%p627_p7)
}
  0x1d   : > { %s631_s15 = scalar_lea.vmem %s829_s28, 1024  ;;  %p639_p2 = scmp.lt.s32.totalorder %s829_s28, %s829_s28 }
  0x1e   : > { %p632_p9 = scmp.ne.s32.totalorder %s829_s28, %s631_s15  ;;  %p640_p6 = scmp.lt.s32.totalorder %s631_s15, %s631_s15 }
  0x20   : > { %p634_p10 = pnand %p632_p9, %p620_p13  ;;  %p641_p4 = por %p640_p6, %p639_p2 }
  0x22   : > { %p635_p1 = pneg %p634_p10 }
  0x24   : > { %p642_p8 = pnand %p641_p4, %p635_p1 }
  0x26   : > { %645 = shalt.err (!%p642_p8)
}
  0x27   : > { %s749_s16 = smov 64   ;;  %s750_s17 = smov 4  }
  0x28   : > { %558 = dma.hbm_to_vmem [thread:$0]  (!%p836_p11), %s992_s1, 1024, %s829_s28, [#allocation6], %s749_s16, %s749_s16, %s750_s17  }
  0x29   : > { %p27_p2 = scmp.eq.s32.totalorder %s26_s7, 0  ;;  %p36_p1 = scmp.ne.s32.totalorder %s742_s20, %s738_s19 }
  0x2a   : > { %p37_p4 = scmp.eq.s32.totalorder %s746_s21, 0  ;;  %p568_p6 = scmp.lt.s32.totalorder %s746_s21, 2 }
  0x2b   : > { %s872_s8 = scalar_select %p27_p2, %s742_s20, %s29_s6  }
  0x2c   : > { %p38_p8 = por %p37_p4, %p36_p1  ;;  %p1004_p10 = scmp.eq.s32.totalorder %s806_s22, 1 }
  0x2d   : > { %s198_s10 = sand.u32 1, %s742_s20   ;;  %s498_s11 = sshll.u32 %s746_s21, 7 }
  0x2e   : > { %p876_p12 = por %p1004_p10, %p36_p1  ;;  %s497_s12 = sshll.u32 %s198_s10, 3 }
  0x2f   : > { %s885_s14 = scalar_lea.hbm %s991_s0, %s498_s11  ;;  %s202_s28 = scalar_lea.vmem [#allocation2], %s497_s12 }
  0x30   : > { %s209_s6 = sshll.u32 %s202_s28, 4  ;;  %p887_p11 = pnand %p568_p6, %p38_p8  ;;  %s891_s6 = int_to_ptr.vmem [resolvable:$true] %s209_s6 }
  0x31   : > { %s199_s15 = scalar_lea.sflag [#allocation3], %s198_s10  ;;  %s646_s16 = scalar_lea.hbm %s885_s14, 128 }
  0x32   : > { %p647_p13 = scmp.ne.s32.totalorder %s885_s14, %s646_s16  ;;  %p648_p0 = pneg %p887_p11 }
  0x33   : > { %s651_s27 = scalar_lea.hbm %s991_s0, 256  ;;  %p652_p7 = scmp.lt.u32.totalorder %s885_s14, %s991_s0 }
  0x34   : > { %p649_p3 = pnand %p648_p0, %p647_p13  ;;  %p653_p9 = scmp.lt.u32.totalorder %s651_s27, %s646_s16 }
  0x35   : > { %p655_p1 = scmp.lt.u32.totalorder %s646_s16, %s885_s14 }
  0x36   : > { %p650_p5 = pneg %p649_p3  ;;  %p654_p2 = por %p653_p9, %p652_p7 }
  0x38   : > { %p656_p4 = por %p655_p1, %p654_p2 }
  0x3a   : > { %p657_p6 = pnand %p656_p4, %p650_p5 }
  0x3c   : > { %660 = shalt.err (!%p657_p6)
}
  0x3d   : > { %s661_s10 = scalar_lea.vmem %s891_s6, 128  ;;  %s751_s29 = smov [#allocation2]  }
  0x3e   : > { %p662_p8 = scmp.ne.s32.totalorder %s891_s6, %s661_s10  ;;  %s666_s13 = sshll.u32 %s751_s29, 4  ;;  %s667_s13 = int_to_ptr.vmem [resolvable:$false] %s666_s13 }
  0x3f   : > { %s668_s28 = scalar_lea.vmem %s667_s13, 256  ;;  %p669_p3 = scmp.lt.s32.totalorder %s891_s6, %s667_s13 }
  0x40   : > { %p664_p10 = pnand %p662_p8, %p648_p0  ;;  %p670_p7 = scmp.lt.s32.totalorder %s668_s28, %s661_s10 }
  0x42   : > { %p665_p13 = pneg %p664_p10  ;;  %p671_p9 = por %p670_p7, %p669_p3 }
  0x44   : > { %p672_p2 = pnand %p671_p9, %p665_p13 }
  0x46   : > { %675 = shalt.err (!%p672_p2)
}
  0x47   : > { %562 = dma.hbm_to_vmem [thread:$0]  (!%p887_p11), %s885_s14, 128, %s891_s6, %s199_s15  }
  0x48   : > { %p1007_p5 = scmp.ne.s32.totalorder %s1002_s26, 0 }
  0x49   : > { %s921_s16 = sand.u32 (!%p1007_p5), 1, %s738_s19   ;;  %p1008_p0 = scmp.ne.s32.totalorder (!%p1007_p5), %s1000_s24, 0 }
  0x4a   : > { %218 = sbr.rel (%p1007_p5) target bundleno = 629 (0x275), region = 40  ;;  %s500_s17 = sshll.u32 (!%p1007_p5), %s921_s16, 3 }
  0x4b   : > { %s221_s23 = scalar_lea.sflag (!%p1007_p5), [#allocation3], %s921_s16  ;;  %s224_s27 = scalar_lea.vmem (!%p1007_p5), [#allocation2], %s500_s17 }
  0x51   : > { %721 = dma.done.wait (%p1008_p0), %s221_s23, 128  }
  0x52   : > { %723 = vsyncadd (%p1008_p0), %s221_s23, 4294967168  ;;  %p1009_p1 = scmp.eq.s32.totalorder %s806_s22, 0 }
  0x54   : > { %725 = dma.done.wait (%p1009_p1), [#allocation6], 1024   ;;  %p1010_p11 = pmov %p1009_p1 }
  0x55   : > { %v256_v0 = vld [vmem:[%s224_s27] sm:$0xff]  ;;  %v608_v1 = vld [vmem:[#allocation5] sm:$0xff]   ;;  %v752_v2 = vmov 0.0   ;;  %v609_v3 = vld [vmem:[#allocation5 + $0x8] sm:$0xff]   ;;  %vm753_vm0 = vmmov 0   ;;  %s502_s7 = sshll.u32 %s921_s16, 2 }
  0x56   : > { %727 = vsyncadd (%p1010_p11), [#allocation6], 4294966272  ;;  %257 = vadd.xlane.f32.xlu0 %v256_v0  ;;  %527 = vmatprep.subr.bf16.mxu0 %v752_v2  ;;  %v610_v8 = vld [vmem:[#allocation5 + $0x10] sm:$0xff]   ;;  %v611_v9 = vld [vmem:[#allocation5 + $0x18] sm:$0xff]   ;;  %s515_s12 = sshll.u32 %s806_s22, 6  ;;  %s254_s10 = scalar_lea.vmem [#allocation7], %s502_s7 }
  0x57   : > { %528 = vmatpush3.bf16.msra.mxu0 %v608_v1  ;;  %v612_v10 = vld [vmem:[#allocation5 + $0x20] sm:$0xff]   ;;  %543 = vmatprep.mubr.msk.bf16.mxu0 %vm753_vm0, %v752_v2  ;;  %v613_v11 = vld [vmem:[#allocation5 + $0x28] sm:$0xff]   ;;  %v614_v12 = vld [vmem:[#allocation5 + $0x30] sm:$0xff]   ;;  %s413_s29 = sshll.u32 %s254_s10, 4  ;;  %s947_s17 = scalar_lea.hbm %s996_s5, %s515_s12  ;;  %s949_s29 = int_to_ptr.vmem [resolvable:$true] %s413_s29 }
  0x58   : > { %529 = vmatprep.subr.bf16.mxu0 %v752_v2  ;;  %v615_v13 = vld [vmem:[#allocation5 + $0x38] sm:$0xff]   ;;  %v503_v18 = vld [vmem:[%s993_s2] ss:$0 sm:$0xff]  ;;  %s400_s23 = scalar_lea.sflag [#allocation4], %s921_s16  ;;  %s676_s22 = scalar_lea.vmem %s949_s29, 64 }
  0x59   : > { %v504_v20 = vld [vmem:[%s994_s3] ss:$0 sm:$0xff]  ;;  %p677_p4 = scmp.ne.s32.totalorder %s949_s29, %s676_s22  ;;  %s754_s27 = smov [#allocation7]  }
  0x5a   : > { %v505_v24 = vld [vmem:[%s995_s4] ss:$0 sm:$0xff]  ;;  %s680_s24 = sshll.u32 %s754_s27, 4  ;;  %s681_s24 = int_to_ptr.vmem [resolvable:$false] %s680_s24 }
  0x5b   : > { %530 = vmatpush3.bf16.msra.mxu0 %v609_v3  ;;  %p678_p6 = pnand %p677_p4, %p876_p12  ;;  %s682_s26 = scalar_lea.vmem %s681_s24, 128 }
  0x5c   : > { %531 = vmatprep.subr.bf16.mxu0 %v752_v2  ;;  %p683_p10 = scmp.lt.s32.totalorder %s949_s29, %s681_s24  ;;  %p684_p13 = scmp.lt.s32.totalorder %s682_s26, %s676_s22 }
  0x5d   : > { %p679_p8 = pneg %p678_p6 }
  0x5e   : > { %p685_p3 = por %p684_p13, %p683_p10 }
  0x5f   : > { %532 = vmatpush3.bf16.msra.mxu0 %v610_v8 }
  0x60   : > { %533 = vmatprep.subr.bf16.mxu0 %v752_v2  ;;  %p686_p7 = pnand %p685_p3, %p679_p8 }
  0x63   : > { %534 = vmatpush3.bf16.msra.mxu0 %v611_v9 }
  0x64   : > { %535 = vmatprep.subr.bf16.mxu0 %v752_v2 }
  0x67   : > { %536 = vmatpush3.bf16.msra.mxu0 %v612_v10 }
  0x68   : > { %537 = vmatprep.subr.bf16.mxu0 %v752_v2 }
  0x6b   : > { %538 = vmatpush3.bf16.msra.mxu0 %v613_v11 }
  0x6c   : > { %539 = vmatprep.subr.bf16.mxu0 %v752_v2 }
  0x6f   : > { %540 = vmatpush3.bf16.msra.mxu0 %v614_v12 }
  0x70   : > { %541 = vmatprep.subr.bf16.mxu0 %v752_v2 }
  0x73   : > { %542 = vmatpush3.bf16.msra.mxu0 %v615_v13 }
  0xe3   : > { %v258_v4 = vpop.xlane.xlu0 %257 }
  0xe4   : > { %v260_v5 = vmul.f32 0.0078125, %v258_v4 }
  0xe6   : > { %v261_v6 = vsub.f32 %v256_v0, %v260_v5 }
  0xe8   : > { %v262_v7 = vmul.f32 %v261_v6, %v261_v6 }
  0xea   : > { %263 = vadd.xlane.f32.xlu0 %v262_v7 }
 0x177   : > { %v264_v14 = vpop.xlane.xlu0 %263 }
 0x178   : > { %v265_v15 = vmul.f32 0.0078125, %v264_v14 }
 0x17a   : > { %v266_v16 = vadd.f32 1e-05, %v265_v15 }
 0x17c   : > { %616 = vrsqrt.f32 %v266_v16 }
 0x186   : > { %v617_v17 = vpop.eup %616 }
 0x187   : > { %v268_v19 = vmul.f32 %v617_v17, %v261_v6 }
 0x189   : > { %v276_v21 = vmul.f32 %v503_v18, %v268_v19 }
 0x18b   : > { %v284_v22 = vadd.f32 %v504_v20, %v276_v21 }
 0x18d   : > { %v285_v23 = vpack.c.bf16 %v284_v22, %v284_v22 }
 0x18f   : > { %544 = vmatmul.mubr.bf16.vlgmr.msra.gmra.mrb[0].mxu0 %v285_v23 }
 0x262   : > { %v391_v25 = vpop.f32.mrb[0].mxu0 }
 0x263   : > { %v392_v26 = vadd.f32 %v505_v24, %v391_v25  ;;  %v545_v27 = vpop.f32.mrb[1].mxu0 }
 0x264   : > { %v394_v28 = vpop.f32.mrb[2].mxu0 }
 0x265   : > { %v397_v29 = vpack.c.bf16 %v392_v26, %v392_v26  ;;  %v546_v30 = vpop.f32.mrb[3].mxu0 }
 0x267   : > { %398 = vst [vmem:[%s254_s10] sm:$0xf] %v397_v29 }
 0x268   : > { %689 = shalt.err (!%p686_p7)
}
 0x269   : > { %s690_s16 = scalar_lea.hbm %s947_s17, 64  ;;  %s694_s7 = scalar_lea.hbm %s996_s5, 128 }
 0x26a   : > { %p691_p9 = scmp.ne.s32.totalorder %s947_s17, %s690_s16  ;;  %p695_p0 = scmp.lt.u32.totalorder %s947_s17, %s996_s5 }
 0x26b   : > { %p696_p1 = scmp.lt.u32.totalorder %s694_s7, %s690_s16  ;;  %p698_p4 = scmp.lt.u32.totalorder %s690_s16, %s947_s17 }
 0x26c   : > { %p692_p2 = pnand %p691_p9, %p876_p12 }
 0x26d   : > { %p697_p11 = por %p696_p1, %p695_p0 }
 0x26e   : > { %p693_p5 = pneg %p692_p2 }
 0x26f   : > { %p699_p6 = por %p698_p4, %p697_p11 }
 0x271   : > { %p700_p8 = pnand %p699_p6, %p693_p5 }
 0x273   : > { %703 = shalt.err (!%p700_p8)
}
 0x274   : > { %553 = dma.vmem_to_hbm [thread:$0]  (%p876_p12), %s949_s29, 64, %s947_s17, %s400_s23  }
 0x275 PF: > { %s425_s12 = sand.u32 1, %s734_s18   ;;  %p1011_p10 = scmp.ne.s32.totalorder %s1001_s25, 0 }
 0x276   : > { %p1012_p13 = scmp.ge.s32.totalorder %s746_s21, 2  ;;  %s426_s10 = scalar_lea.sflag [#allocation4], %s425_s12 }
 0x278   : > { %p564_p3 = pnand %p1012_p13, %p1011_p10 }
 0x27a   : > { %729 = dma.done.wait (!%p564_p3), %s426_s10, 64  }
 0x27b   : > { %731 = vsyncadd (!%p564_p3), %s426_s10, 4294967232  ;;  %p19_p7 = scmp.ge.s32.totalorder %s841_s30, 4   ;;  %s1013_s18 = smov %s738_s19 }
 0x27c   : > { %s1014_s19 = smov %s742_s20  ;;  %s1015_s20 = smov %s872_s8 }
 0x27d   : > { %s1016_s21 = smov %s841_s30  ;;  %21 = sbr.rel (!%p19_p7) target bundleno = 6 (0x6), region = 89 }
 0x284   :  { %431 = vsyncpa [#allocation3], 1 }
 0x285   :  { %433 = vsyncpa [#allocation3 + $0x1], 1 }
 0x286   :  { %434 = vsyncpa [#allocation6], 1 }
 0x287   :  { %435 = vsyncpa [#allocation4], 1 }
 0x288   :  { %437 = vsyncpa [#allocation4 + $0x1], 1 }

</bundles_post_ra>
